<compile_context>
chip_gen: v7x
topology: tpu7x:2x2x1
jax: 0.10.0
libtpu: 0.0.40
codegen_flags: <defaults>
</compile_context>

<pallas_src>
import functools
import numpy as np
import jax
import jax.numpy as jnp
from jax.experimental import pallas as pl
from jax.experimental.pallas import tpu as pltpu


# -----------------------------------------------------------------------------
# Hash construction (faithful numpy port of ABC_2D_Large._build_hash).
# Run once on host at init time.  Returns both the original-style
# (conv_hash, zerofy_hash) pair (used only for the reference check) and the
# optimized column-ordered sentinel gather table used by the kernel path.
# -----------------------------------------------------------------------------
def build_hash(hashtable, in_channel, kernel_size, perceptual_size, stride, batch_size):
    # hashtable: np.ndarray (HC, HH, HW, HH*HW)
    order = np.argsort(-hashtable, axis=-1)  # descending argsort
    HC, HH, HW, HHW = order.shape
    KH, KW = kernel_size
    assert in_channel % HC == 0
    assert HH * HW == HHW
    NH = HH // stride[0]
    NW = HW // stride[1]
    kl = KH * KW

    batch_conv_t = np.zeros((HC, NH, NW, kl), dtype=np.int64)
    batch_zero_t = np.zeros((HC, NH, NW, kl), dtype=np.float32)
    for c in range(HC):
        for hi in range(NH):
            h = hi * stride[0]
            for wi in range(NW):
                w = wi * stride[1]
                n = 0
                pc = np.zeros((KH, KW), dtype=np.int64)
                pz = np.ones((KH, KW), dtype=np.float32)
                for i in order[c, h, w, :]:
                    if n < perceptual_size:
                        # NOTE: matches the PyTorch reference, which uses HH for both
                        # the row divisor and the column modulus; this only differs
                        # from (i // HW, i % HW) when HH != HW.
                        irh = i // HH - h
                        irw = i % HH - w
                        if abs(irh) <= (KH - 1) / 2 and abs(irw) <= (KW - 1) / 2:
                            pc[int(irh + (KH - 1) / 2), int(irw + (KW - 1) / 2)] = i
                            pz[int(irh + (KH - 1) / 2), int(irw + (KW - 1) / 2)] = 0
                            n += 1
                batch_conv_t[c, hi, wi] = pc.reshape(-1)
                batch_zero_t[c, hi, wi] = pz.reshape(-1)
        batch_conv_t[c] += c * HH * HW

    reps = in_channel // HC
    conv_c = np.concatenate(
        [batch_conv_t + r * HC * HH * HW for r in range(reps)], axis=0
    )  # (in_channel, NH, NW, kl)
    zero_c = np.concatenate([batch_zero_t] * reps, axis=0)

    conv_hash = np.stack(
        [conv_c + b * in_channel * HH * HW for b in range(batch_size)], axis=0
    )  # (batch_size, in_channel, NH, NW, kl)
    zerofy_hash = np.stack([zero_c] * batch_size, axis=0).astype(np.float32)

    # ---- Optimized table: fold the zerofy mask into sentinel (OOB) indices and
    # lay the table out column-major so the gather directly produces
    # G of shape (C*kl, B*NH*NW) with no transpose copy.
    sentinel = batch_size * in_channel * HH * HW  # out-of-bounds for any B <= batch_size
    conv_sent = np.where(zerofy_hash == 1.0, sentinel, conv_hash)  # (B, C, NH, NW, kl)
    conv_cols = np.transpose(conv_sent, (1, 4, 0, 2, 3)).reshape(
        in_channel * kl, batch_size * NH * NW
    )
    return (
        conv_hash.astype(np.int32),
        zerofy_hash,
        conv_cols.astype(np.int32),
        sentinel,
        NH,
        NW,
    )


# -----------------------------------------------------------------------------
# Pallas kernel: MXU matmul + bias.  (Zerofy already folded into the gather.)
# -----------------------------------------------------------------------------
def _abc_kernel(w_ref, g_ref, b_ref, o_ref, *, if_bias):
    acc = jnp.dot(w_ref[...], g_ref[...], preferred_element_type=jnp.float32)  # MXU
    if if_bias:
        acc = acc + b_ref[...]
    o_ref[...] = acc.astype(o_ref.dtype)


def _choose_tn(O, K, n_cols, in_itemsize, budget_bytes):
    """Largest column tile (multiple of 128) whose double-buffered working set
    fits the per-block VMEM budget; never wider than the (128-rounded) N."""
    n128 = max(128, ((n_cols + 127) // 128) * 128)
    tn = 128
    for cand in (2048, 1024, 512, 256, 128):
        need = (
            2 * K * cand * in_itemsize   # G blocks (double buffered)
            + 2 * O * cand * 4           # output blocks
            + 2 * O * K * in_itemsize    # weights
            + 2 * O * 4                  # bias
        )
        if need <= budget_bytes:
            tn = cand
            break
    return min(tn, n128)


def abc_matmul(weights, g, bias, *, tn, if_bias=True):
    # weights: (O, K); g: (K, N); bias: (O, 1)  -> out: (O, N), N % tn == 0.
    O, K = weights.shape
    Kg, N = g.shape
    assert Kg == K
    assert tn % 128 == 0 and N % tn == 0
    grid = (N // tn,)

    in_itm = jnp.dtype(g.dtype).itemsize
    block_bytes = 2 * K * tn * in_itm + 2 * O * tn * 4 + 2 * O * K * in_itm + 2 * O * 4
    # Explicit scoped-VMEM limit (with headroom), kept under v7x's 64 MiB VMEM.
    vmem_limit = int(min(max(2 * block_bytes + (4 << 20), 16 << 20), 60 << 20))

    return pl.pallas_call(
        functools.partial(_abc_kernel, if_bias=if_bias),
        out_shape=jax.ShapeDtypeStruct((O, N), jnp.float32),
        grid_spec=pltpu.PrefetchScalarGridSpec(
            num_scalar_prefetch=0,
            grid=grid,
            in_specs=[
                pl.BlockSpec((O, K), lambda j: (0, 0)),    # weights (resident)
                pl.BlockSpec((K, tn), lambda j: (0, j)),   # gathered columns
                pl.BlockSpec((O, 1), lambda j: (0, 0)),    # bias
            ],
            out_specs=pl.BlockSpec((O, tn), lambda j: (0, j)),
        ),
        compiler_params=pltpu.CompilerParams(
            dimension_semantics=("parallel",),
            vmem_limit_bytes=vmem_limit,
        ),
    )(weights, g, bias)


# -----------------------------------------------------------------------------
# Forward pass (matches ABC_2D_Large.forward semantics).
# -----------------------------------------------------------------------------
def abc_2d_large_forward(x, weights, bias, conv_cols, sentinel, nh, nw,
                         out_channel, if_bias=True, compute_dtype=jnp.float32,
                         vmem_block_budget_bytes=24 << 20):
    B, C, H, W = x.shape
    K, max_cols = conv_cols.shape
    n = B * nh * nw
    if n > max_cols:
        raise ValueError("batch size exceeds the precomputed hash batch_size")

    tn = _choose_tn(out_channel, K, n, jnp.dtype(compute_dtype).itemsize,
                    vmem_block_budget_bytes)
    n_pad = ((n + tn - 1) // tn) * tn

    idx = conv_cols[:, :n]                      # column-ordered, sentinel-masked
    if n_pad > n:
        idx = jnp.pad(idx, ((0, 0), (0, n_pad - n)), constant_values=sentinel)

    # img_reconstruction, fused: sentinel (out-of-bounds) entries read 0.0, and the
    # table layout means the gather emits G directly as (C*kl, n_pad) — no
    # transpose copy and no separate zerofy-mask stream.
    # TODO(synk): the gather itself still runs in XLA; fusing it into the kernel
    # (scalar-prefetched indices + in-VMEM take) would save one G read+write.
    g = jnp.take(x.reshape(-1), idx, mode="fill", fill_value=0.0).astype(compute_dtype)

    out = abc_matmul(weights.astype(compute_dtype), g, bias, tn=tn, if_bias=if_bias)
    out = out[:, :n].reshape(out_channel, B, nh, nw)
    return jnp.swapaxes(out, 0, 1)              # (B, O, NH, NW)


if __name__ == "__main__":
    # Small deterministic configuration.
    in_channel = 4
    out_channel = 8
    kernel_size = (3, 3)
    kl = kernel_size[0] * kernel_size[1]
    perceptual_size = 4
    stride = (1, 1)
    batch_size = 4           # max batch supported by the precomputed hash
    HC, HH, HW = 2, 8, 8     # hash: 2 hash-channels over an 8x8 image
    B = 2                    # actual batch

    key = jax.random.PRNGKey(0)
    k_hash, k_w, k_b, k_x = jax.random.split(key, 4)

    # Hash table (random, deterministic) -> static gather indices.
    hashtable = np.asarray(
        jax.random.uniform(k_hash, (HC, HH, HW, HH * HW), dtype=jnp.float32)
    )
    (conv_hash_np, zerofy_hash_np, conv_cols_np, sentinel, NH, NW) = build_hash(
        hashtable, in_channel, kernel_size, perceptual_size, stride, batch_size
    )
    conv_hash = jnp.asarray(conv_hash_np)        # reference path only
    zerofy_hash = jnp.asarray(zerofy_hash_np)    # reference path only
    conv_cols = jnp.asarray(conv_cols_np)        # kernel path

    # Parameters (uniform init like the PyTorch module).
    a = np.sqrt(1.0 / in_channel / perceptual_size)
    weights = jax.random.uniform(
        k_w, (out_channel, in_channel * kl), minval=-a, maxval=a, dtype=jnp.float32
    )
    bias = jax.random.uniform(
        k_b, (out_channel, 1), minval=-a, maxval=a, dtype=jnp.float32
    )

    # Input x in NCHW with H, W matching the hash-implied image size.
    x = jax.random.normal(k_x, (B, in_channel, HH, HW), dtype=jnp.float32)

    # --- Kernel path (f32 streaming) ---
    out = abc_2d_large_forward(
        x, weights, bias, conv_cols, sentinel, NH, NW, out_channel, if_bias=True
    )
    out = jax.block_until_ready(out)
    assert out.shape == (B, out_channel, HH // stride[0], HW // stride[1])

    # --- Pure-JAX reference with the original module semantics ---
    gathered = jnp.take(x.reshape(-1), conv_hash[:B])
    gathered = gathered * (1.0 - zerofy_hash[:B])
    g_ref = jnp.transpose(gathered, (1, 4, 0, 2, 3)).reshape(
        in_channel * kl, B * NH * NW
    )
    ref = (weights @ g_ref + bias).reshape(out_channel, B, NH, NW)
    ref = jnp.swapaxes(ref, 0, 1)
    np.testing.assert_allclose(np.asarray(out), np.asarray(ref), atol=1e-4, rtol=1e-4)

    # --- Kernel path (bf16 streaming of W/G, f32 MXU accumulation) ---
    out_bf16 = abc_2d_large_forward(
        x, weights, bias, conv_cols, sentinel, NH, NW, out_channel,
        if_bias=True, compute_dtype=jnp.bfloat16,
    )
    out_bf16 = jax.block_until_ready(out_bf16)
    np.testing.assert_allclose(np.asarray(out_bf16), np.asarray(ref),
                               atol=5e-2, rtol=5e-2)

    print("KERNEL_OK")
</pallas_src>

<mosaic_0001>
module attributes {stable_mosaic.version = 11 : i64} {
  func.func @_abc_kernel(%arg0: i32, %arg1: memref<8x36xf32, #tpu.memory_space<vmem>>, %arg2: memref<36x128xf32, #tpu.memory_space<vmem>>, %arg3: memref<8x1xf32, #tpu.memory_space<vmem>>, %arg4: memref<8x128xf32, #tpu.memory_space<vmem>>) attributes {dimension_semantics = [#tpu.dimension_semantics<parallel>], iteration_bounds = array<i64: 1>, scalar_prefetch = 0 : i64, scratch_operands = 0 : i64, tpu.core_type = #tpu.core_type<tc>, window_params = [{pipeline_mode = #tpu.pipeline_mode<synchronous>, transform_indices = @transform_0, window_bounds = array<i64: 8, 36>}, {transform_indices = @transform_1, window_bounds = array<i64: 36, 128>}, {pipeline_mode = #tpu.pipeline_mode<synchronous>, transform_indices = @transform_2, window_bounds = array<i64: 8, 1>}, {transform_indices = @transform_3, window_bounds = array<i64: 8, 128>}]} {
    %c0 = arith.constant 0 : index
    %c0_0 = arith.constant 0 : index
    %0 = vector.load %arg1[%c0, %c0_0] : memref<8x36xf32, #tpu.memory_space<vmem>>, vector<8x36xf32>
    %c0_1 = arith.constant 0 : index
    %c0_2 = arith.constant 0 : index
    %1 = vector.load %arg2[%c0_1, %c0_2] : memref<36x128xf32, #tpu.memory_space<vmem>>, vector<36x128xf32>
    %cst = arith.constant dense<0.000000e+00> : vector<8x128xf32>
    %2 = tpu.matmul %0, %1, %cst {dimension_numbers = #tpu.dot_dimension_numbers<[1], [0], [0], [1], [0, 0, 1, 1], [], []>} : vector<8x36xf32>, vector<36x128xf32>, vector<8x128xf32> -> vector<8x128xf32>
    %c0_3 = arith.constant 0 : index
    %c0_4 = arith.constant 0 : index
    %3 = vector.load %arg3[%c0_3, %c0_4] : memref<8x1xf32, #tpu.memory_space<vmem>>, vector<8x1xf32>
    %4 = vector.broadcast %3 : vector<8x1xf32> to vector<8x128xf32>
    %5 = arith.addf %2, %4 : vector<8x128xf32>
    %c0_5 = arith.constant 0 : index
    %c0_6 = arith.constant 0 : index
    %6 = vector.load %arg4[%c0_5, %c0_6] : memref<8x128xf32, #tpu.memory_space<vmem>>, vector<8x128xf32>
    tpu.vector_store %arg4[%c0_5, %c0_6], %5 {strides = array<i32>} : memref<8x128xf32, #tpu.memory_space<vmem>>, vector<8x128xf32>,
    return
  }
  func.func @transform_0(%arg0: i32) -> (i32, i32) {
    %c0_i32 = arith.constant 0 : i32
    %c0_i32_0 = arith.constant 0 : i32
    %c0_i32_1 = arith.constant 0 : i32
    return %c0_i32, %c0_i32_0 : i32, i32
  }
  func.func @transform_1(%arg0: i32) -> (i32, i32) {
    %c0_i32 = arith.constant 0 : i32
    %c0_i32_0 = arith.constant 0 : i32
    return %c0_i32, %arg0 : i32, i32
  }
  func.func @transform_2(%arg0: i32) -> (i32, i32) {
    %c0_i32 = arith.constant 0 : i32
    %c0_i32_0 = arith.constant 0 : i32
    %c0_i32_1 = arith.constant 0 : i32
    return %c0_i32, %c0_i32_0 : i32, i32
  }
  func.func @transform_3(%arg0: i32) -> (i32, i32) {
    %c0_i32 = arith.constant 0 : i32
    %c0_i32_0 = arith.constant 0 : i32
    return %c0_i32, %arg0 : i32, i32
  }
}

</mosaic_0001>

<bundles_post_ra>
// kernel: tpu_custom_call.1
= control target key start
LH: loop header
LB: loop body
LE: loop exit
PB: predicated region body
PF: predicated region fallthrough
CT: control target
= control target key end

     0   :  { %8 = vsyncpa [#allocation3], 0  ;;  %s277_s0 = inlined_call_operand.vmem [shape: f32[8,36], index: 0, kind: input, shape index: {}]   ;;  %s278_s1 = inlined_call_operand.hbm [shape: f32[36,128], index: 1, kind: input, shape index: {}]   ;;  %s279_s2 = inlined_call_operand.vmem [shape: f32[8,1], index: 2, kind: input, shape index: {}]   ;;  %s280_s3 = inlined_call_operand.hbm [shape: f32[8,128], index: 3, kind: output, shape index: {}]  }
   0x1   :  { %9 = vsyncpa [#allocation4], 0  ;;  %s219_s12 = smov [#allocation2]   ;;  %s171_s16 = scalar_lea.hbm %s278_s1, 640 }
   0x2   :  { %s17_s13 = sshll.u32 %s219_s12, 4  ;;  %p172_p0 = scmp.ne.s32.totalorder %s278_s1, %s171_s16  ;;  %s18_s13 = int_to_ptr.vmem [resolvable:$true] %s17_s13 }
   0x3   :  { %p175_p1 = scmp.lt.u32.totalorder %s171_s16, %s278_s1 }
   0x5   :  { %p177_p2 = pnand %p175_p1, %p172_p0 }
   0x7   :  { %180 = shalt.err (!%p177_p2)
}
   0x8   :  { %s181_s21 = scalar_lea.vmem %s18_s13, 640  ;;  %p186_p4 = scmp.lt.s32.totalorder %s18_s13, %s18_s13 }
   0x9   :  { %p182_p3 = scmp.ne.s32.totalorder %s18_s13, %s181_s21  ;;  %p187_p5 = scmp.lt.s32.totalorder %s181_s21, %s181_s21 }
   0xb   :  { %p188_p6 = por %p187_p5, %p186_p4 }
   0xd   :  { %p189_p7 = pnand %p188_p6, %p182_p3 }
   0xf   :  { %192 = shalt.err (!%p189_p7)
}
  0x10   :  { %s220_s22 = smov 128   ;;  %s221_s23 = smov 8  }
  0x11   :  { %23 = dma.hbm_to_vmem [thread:$0]  %s278_s1, 640, %s18_s13, [#allocation3], %s220_s22, %s220_s22, %s221_s23  }
  0x12   :  { %215 = dma.done.wait [#allocation3], 640  }
  0x13   :  { %216 = vsyncadd [#allocation3], 4294966656  ;;  %v222_v0 = vmov 0.0|0.0   ;;  %vm223_vm0 = vmmov 0   ;;  %v224_v1 = vmov 0.0   ;;  %v225_v2 = vmov 0  }
  0x14   :  { %156 = vmatprep.subr.bf16.mxu0 %v222_v0  ;;  %153 = vmatprep.mubr.msk.f32.mxu0 %vm223_vm0, %v224_v1  ;;  %v30_v3 = vld [vmem:[#allocation2] sm:$0xff]  ;;  %v31_v4 = vld [vmem:[#allocation2 + $0x8] sm:$0xff]  ;;  %v32_v5 = vld [vmem:[#allocation2 + $0x10] sm:$0xff]  ;;  %vm45_vm1 = vcmask 1043456   ;;  %vm41_vm2 = vcmask 293888   ;;  %s226_s29 = smov [#allocation5]  }
  0x15   :  { %170 = vset.pattern.permute.xlu0 %v225_v2  ;;  %v157_v6 = vpack.c.bf16 %v31_v4, %v30_v3  ;;  %v33_v7 = vld [vmem:[#allocation2 + $0x18] sm:$0xff]  ;;  %v35_v8 = vld [vmem:[%s279_s2] sm:$0xff]  ;;  %s126_s30 = sshll.u32 %s226_s29, 4  ;;  %s127_s30 = int_to_ptr.vmem [resolvable:$true] %s126_s30 }
  0x16   :  { %v160_v9 = vpack.c.bf16 %v33_v7, %v32_v5  ;;  %38 = vperm.xlu0 %170, %v35_v8   ;;  %v34_v10 = vld [vmem:[#allocation2 + $0x20] sm:$0xf]  ;;  %s193_s2 = scalar_lea.vmem %s127_s30, 128  ;;  %p198_p9 = scmp.lt.s32.totalorder %s127_s30, %s127_s30 }
  0x17   :  { %158 = vmatpush3.bf16.msra.mxu0 %v157_v6  ;;  %v29_v11 = vld [vmem:[%s277_s0] sm:$0xff]  ;;  %p194_p8 = scmp.ne.s32.totalorder %s127_s30, %s193_s2  ;;  %p199_p10 = scmp.lt.s32.totalorder %s193_s2, %s193_s2 }
  0x18   :  { %159 = vmatprep.subr.bf16.mxu0 %v222_v0 }
  0x19   :  { %p200_p11 = por %p199_p10, %p198_p9 }
  0x1b   :  { %161 = vmatpush3.bf16.msra.mxu0 %v160_v9  ;;  %p201_p12 = pnand %p200_p11, %p194_p8 }
  0x1c   :  { %151 = vmatprep.subr.mxu0 %v224_v1 }
  0x1f   :  { %152 = vmatpush3.msk.msra.mxu0 %vm45_vm1, %v34_v10 }
  0x20   :  { %154 = vmatmul.mubr.msk.f32.vlgmr.msra.gmra.mrb[0].mxu0 %vm41_vm2, %v29_v11 }
  0x95   :  { %v39_v12 = vpop.permute.xlu0 %38 }
  0xf3   :  { %v115_v13 = vpop.f32.mrb[0].mxu0 }
  0xf4   :  { %v116_v14 = vadd.f32 %v115_v13, %v39_v12  ;;  %v155_v15 = vpop.f32.mrb[1].mxu0 }
  0xf6   :  { %119 = vst [vmem:[#allocation5] sm:$0xff] %v116_v14 }
  0xf7   :  { %204 = shalt.err (!%p201_p12)
}
  0xf8   :  { %s205_s5 = scalar_lea.hbm %s280_s3, 128 }
  0xf9   :  { %p206_p13 = scmp.ne.s32.totalorder %s280_s3, %s205_s5  ;;  %p209_p0 = scmp.lt.u32.totalorder %s205_s5, %s280_s3 }
  0xfb   :  { %p211_p1 = pnand %p209_p0, %p206_p13 }
  0xfd   :  { %214 = shalt.err (!%p211_p1)
}
  0xfe   :  { %129 = dma.vmem_to_hbm [thread:$0]  %s127_s30, 128, %s280_s3, [#allocation4]  }
  0xff   :  { %217 = dma.done.wait [#allocation4], 128  }
 0x100   :  { %218 = vsyncadd [#allocation4], 4294967168 }
 0x101   :  { %133 = vsyncpa [#allocation3], 1 }
 0x102   :  { %134 = vsyncpa [#allocation4], 1 }

</bundles_post_ra>
